<compile_context>
chip_gen: v6e
topology: v6e:2x2x1
jax: 0.10.0
libtpu: 0.0.40
codegen_flags: <defaults>
</compile_context>

<pallas_src>
import functools
import math

import jax
import jax.numpy as jnp
from jax.experimental import pallas as pl
from jax.experimental.pallas import tpu as pltpu

# Max lanes per D tile. f32 worst case: 8 * 65536 * 4 B * 2 inputs * 2 buffers
# = 8 MiB of live input tiles -> fits the default scoped VMEM on every gen.
_MAX_TD = 65536


def _psnr_kernel(x_ref, y_ref, o_ref, acc_ref, *, inv_d: float):
    # Grid: (batch_tile i, d_tile k); k is the reduction axis (last).
    k = pl.program_id(1)

    @pl.when(k == 0)
    def _():
        acc_ref[...] = jnp.zeros_like(acc_ref)

    # Cast to f32 in-kernel; accumulate squared error in f32 scratch.
    diff = x_ref[...].astype(jnp.float32) - y_ref[...].astype(jnp.float32)
    acc_ref[...] += jnp.sum(diff * diff, axis=-1, keepdims=True)

    @pl.when(k == pl.num_programs(1) - 1)
    def _():
        mse = acc_ref[...] * inv_d
        # 10 * log10(1/mse) == -(10/ln 10) * ln(mse); single log at finalize.
        o_ref[...] = (-10.0 / math.log(10.0)) * jnp.log(mse)


def _round_up(x: int, m: int) -> int:
    return (x + m - 1) // m * m


def psnr(input_tensor: jax.Array, target_tensor: jax.Array) -> jax.Array:
    """Pallas PSNR. Inputs are NCHW arrays of identical shape; returns (B,) f32."""
    B, C, H, W = input_tensor.shape
    D = C * H * W

    x = input_tensor.reshape(B, D)
    y = target_tensor.reshape(B, D)

    # ---- tile sizing ----
    # Lane axis: pad D to a multiple of 128, then pick the largest
    # multiple-of-128 tile (<= _MAX_TD) that evenly divides the padded D.
    d_pad = _round_up(D, 128)
    td = 128
    for mult in range(min(_MAX_TD, d_pad) // 128, 0, -1):
        cand = 128 * mult
        if d_pad % cand == 0:
            td = cand
            break

    # Sublane axis: small batches use the full batch dim (allowed when the
    # block dim equals the array dim); bigger batches tile by 8.
    if B <= 8:
        tb = B
        b_pad = B
    else:
        tb = 8
        b_pad = _round_up(B, 8)

    # Zero-pad if needed. Padded positions contribute 0 squared error, and the
    # mean divides by the true D, so real rows are unaffected; padded output
    # rows are sliced off below.
    if (b_pad, d_pad) != (B, D):
        x = jnp.pad(x, ((0, b_pad - B), (0, d_pad - D)))
        y = jnp.pad(y, ((0, b_pad - B), (0, d_pad - D)))

    grid = (b_pad // tb, d_pad // td)

    out = pl.pallas_call(
        functools.partial(_psnr_kernel, inv_d=1.0 / D),
        out_shape=jax.ShapeDtypeStruct((b_pad, 1), jnp.float32),
        grid=grid,
        in_specs=[
            pl.BlockSpec((tb, td), lambda i, k: (i, k)),
            pl.BlockSpec((tb, td), lambda i, k: (i, k)),
        ],
        # Output block index is constant across the reduction axis -> resident
        # accumulator-style output, written once per batch tile at finalize.
        out_specs=pl.BlockSpec((tb, 1), lambda i, k: (i, 0)),
        scratch_shapes=[pltpu.VMEM((tb, 1), jnp.float32)],
        compiler_params=pltpu.CompilerParams(
            dimension_semantics=("parallel", "arbitrary")),
    )(x, y)

    return out[:B, 0]


def _psnr_ref(x, y):
    B = x.shape[0]
    diff = (x.astype(jnp.float32) - y.astype(jnp.float32)).reshape(B, -1)
    mse = jnp.mean(diff * diff, axis=1)
    return 10.0 * jnp.log10(1.0 / mse)


if __name__ == "__main__":
    key = jax.random.PRNGKey(0)
    k1, k2 = jax.random.split(key)
    B, C, H, W = 2, 4, 16, 16
    # images in [0, 1] (PSNR assumes peak value 1)
    x = jax.random.uniform(k1, (B, C, H, W), dtype=jnp.float32)
    noise = 0.05 * jax.random.normal(k2, (B, C, H, W), dtype=jnp.float32)
    y = jnp.clip(x + noise, 0.0, 1.0)

    out = psnr(x, y)
    out = jax.block_until_ready(out)

    ref = _psnr_ref(x, y)
    assert out.shape == (B,), out.shape
    assert jnp.allclose(out, ref, rtol=1e-5, atol=1e-4), (out, ref)
    print("KERNEL_OK")
</pallas_src>

<mosaic_0001>
module attributes {stable_mosaic.version = 11 : i64} {
  func.func @_psnr_kernel(%arg0: i32, %arg1: i32, %arg2: memref<2x1024xf32, #tpu.memory_space<vmem>>, %arg3: memref<2x1024xf32, #tpu.memory_space<vmem>>, %arg4: memref<2x1xf32, #tpu.memory_space<vmem>>, %arg5: memref<2x1xf32, #tpu.memory_space<vmem>>) attributes {dimension_semantics = [#tpu.dimension_semantics<parallel>, #tpu.dimension_semantics<arbitrary>], iteration_bounds = array<i64: 1, 1>, scalar_prefetch = 0 : i64, scratch_operands = 1 : i64, tpu.core_type = #tpu.core_type<tc>, window_params = [{transform_indices = @transform_0, window_bounds = array<i64: 2, 1024>}, {transform_indices = @transform_1, window_bounds = array<i64: 2, 1024>}, {transform_indices = @transform_2, window_bounds = array<i64: 2, 1>}]} {
    %c0_i32 = arith.constant 0 : i32
    %0 = arith.cmpi eq, %arg1, %c0_i32 : i32
    %1 = arith.extui %0 : i1 to i32
    %c0_i32_0 = arith.constant 0 : i32
    %2 = arith.cmpi ne, %1, %c0_i32_0 : i32
    scf.if %2 {
      %cst_10 = arith.constant 0.000000e+00 : f32
      %15 = vector.broadcast %cst_10 : f32 to vector<2x1xf32>
      %c0_11 = arith.constant 0 : index
      %c0_12 = arith.constant 0 : index
      %16 = vector.load %arg5[%c0_11, %c0_12] : memref<2x1xf32, #tpu.memory_space<vmem>>, vector<2x1xf32>
      tpu.vector_store %arg5[%c0_11, %c0_12], %15 {strides = array<i32>} : memref<2x1xf32, #tpu.memory_space<vmem>>, vector<2x1xf32>,
    } else {
    }
    %c0 = arith.constant 0 : index
    %c0_1 = arith.constant 0 : index
    %3 = vector.load %arg2[%c0, %c0_1] : memref<2x1024xf32, #tpu.memory_space<vmem>>, vector<2x1024xf32>
    %c0_2 = arith.constant 0 : index
    %c0_3 = arith.constant 0 : index
    %4 = vector.load %arg3[%c0_2, %c0_3] : memref<2x1024xf32, #tpu.memory_space<vmem>>, vector<2x1024xf32>
    %5 = arith.subf %3, %4 : vector<2x1024xf32>
    %c0_4 = arith.constant 0 : index
    %c0_5 = arith.constant 0 : index
    %6 = vector.load %arg5[%c0_4, %c0_5] : memref<2x1xf32, #tpu.memory_space<vmem>>, vector<2x1xf32>
    %7 = arith.mulf %5, %5 : vector<2x1024xf32>
    %cst = arith.constant dense<0.000000e+00> : vector<2xf32>
    %8 = vector.multi_reduction <add>, %7, %cst [1] : vector<2x1024xf32> to vector<2xf32>
    %9 = vector.shape_cast %8 : vector<2xf32> to vector<2x1xf32>
    %10 = arith.addf %6, %9 : vector<2x1xf32>
    %c0_6 = arith.constant 0 : index
    %c0_7 = arith.constant 0 : index
    %11 = vector.load %arg5[%c0_6, %c0_7] : memref<2x1xf32, #tpu.memory_space<vmem>>, vector<2x1xf32>
    tpu.vector_store %arg5[%c0_6, %c0_7], %10 {strides = array<i32>} : memref<2x1xf32, #tpu.memory_space<vmem>>, vector<2x1xf32>,
    %c0_i32_8 = arith.constant 0 : i32
    %12 = arith.cmpi eq, %arg1, %c0_i32_8 : i32
    %13 = arith.extui %12 : i1 to i32
    %c0_i32_9 = arith.constant 0 : i32
    %14 = arith.cmpi ne, %13, %c0_i32_9 : i32
    scf.if %14 {
      %c0_10 = arith.constant 0 : index
      %c0_11 = arith.constant 0 : index
      %15 = vector.load %arg5[%c0_10, %c0_11] : memref<2x1xf32, #tpu.memory_space<vmem>>, vector<2x1xf32>
      %cst_12 = arith.constant 9.765625E-4 : f32
      %16 = vector.broadcast %cst_12 : f32 to vector<2x1xf32>
      %17 = arith.mulf %15, %16 : vector<2x1xf32>
      %18 = math.log %17 : vector<2x1xf32>
      %cst_13 = arith.constant -4.34294462 : f32
      %19 = vector.broadcast %cst_13 : f32 to vector<2x1xf32>
      %20 = arith.mulf %19, %18 : vector<2x1xf32>
      %c0_14 = arith.constant 0 : index
      %c0_15 = arith.constant 0 : index
      %21 = vector.load %arg4[%c0_14, %c0_15] : memref<2x1xf32, #tpu.memory_space<vmem>>, vector<2x1xf32>
      tpu.vector_store %arg4[%c0_14, %c0_15], %20 {strides = array<i32>} : memref<2x1xf32, #tpu.memory_space<vmem>>, vector<2x1xf32>,
    } else {
    }
    return
  }
  func.func @transform_0(%arg0: i32, %arg1: i32) -> (i32, i32) {
    %c0_i32 = arith.constant 0 : i32
    return %arg0, %arg1 : i32, i32
  }
  func.func @transform_1(%arg0: i32, %arg1: i32) -> (i32, i32) {
    %c0_i32 = arith.constant 0 : i32
    return %arg0, %arg1 : i32, i32
  }
  func.func @transform_2(%arg0: i32, %arg1: i32) -> (i32, i32) {
    %c0_i32 = arith.constant 0 : i32
    %c0_i32_0 = arith.constant 0 : i32
    return %arg0, %c0_i32 : i32, i32
  }
}

</mosaic_0001>

<bundles_post_ra>
// kernel: tpu_custom_call.1
= control target key start
LH: loop header
LB: loop body
LE: loop exit
PB: predicated region body
PF: predicated region fallthrough
CT: control target
= control target key end

     0   :  { %7 = vsyncpa [#allocation4], 0  ;;  %s219_s0 = inlined_call_operand.hbm [shape: f32[2,1024], index: 0, kind: input, shape index: {}]   ;;  %s220_s1 = inlined_call_operand.hbm [shape: f32[2,1024], index: 1, kind: input, shape index: {}]   ;;  %s221_s2 = inlined_call_operand.vmem [shape: f32[2,1], index: 2, kind: output, shape index: {}]  }
   0x1   :  { %8 = vsyncpa [#allocation6], 0  ;;  %s180_s9 = smov [#allocation3]   ;;  %s181_s11 = smov [#allocation5]  }
   0x2   :  { %s15_s10 = sshll.u32 %s180_s9, 4  ;;  %s25_s12 = sshll.u32 %s181_s11, 4  ;;  %s16_s10 = int_to_ptr.vmem [resolvable:$true] %s15_s10  ;;  %s26_s12 = int_to_ptr.vmem [resolvable:$true] %s25_s12 }
   0x3   :  { %s144_s13 = scalar_lea.vmem %s16_s10, 256  ;;  %p149_p1 = scmp.lt.s32.totalorder %s16_s10, %s16_s10 }
   0x4   :  { %p145_p0 = scmp.ne.s32.totalorder %s16_s10, %s144_s13  ;;  %p150_p2 = scmp.lt.s32.totalorder %s144_s13, %s144_s13 }
   0x6   :  { %p151_p3 = por %p150_p2, %p149_p1 }
   0x8   :  { %p152_p4 = pnand %p151_p3, %p145_p0 }
   0xa   :  { %155 = shalt.err (!%p152_p4)
}
   0xb   :  { %18 = dma.hbm_to_vmem [thread:$0]  %s219_s0, 256, %s16_s10, [#allocation4]  }
   0xc   :  { %s164_s16 = scalar_lea.vmem %s26_s12, 256  ;;  %p169_p6 = scmp.lt.s32.totalorder %s26_s12, %s26_s12 }
   0xd   :  { %p165_p5 = scmp.ne.s32.totalorder %s26_s12, %s164_s16  ;;  %p170_p7 = scmp.lt.s32.totalorder %s164_s16, %s164_s16 }
   0xf   :  { %p171_p8 = por %p170_p7, %p169_p6 }
  0x11   :  { %p172_p9 = pnand %p171_p8, %p165_p5 }
  0x13   :  { %175 = shalt.err (!%p172_p9)
}
  0x14   :  { %28 = dma.hbm_to_vmem [thread:$0]  %s220_s1, 256, %s26_s12, [#allocation6]  }
  0x15   :  { %176 = dma.done.wait [#allocation4], 256  }
  0x16   :  { %177 = vsyncadd [#allocation4], 4294967040 }
  0x17   :  { %178 = dma.done.wait [#allocation6], 256  }
  0x18   :  { %179 = vsyncadd [#allocation6], 4294967040  ;;  %v56_v0 = vlaneseq  ;;  %vm39_vm0 = vcmask 1024   ;;  %v182_v1 = vmov 1983009808   ;;  %v183_v3 = vmov 0.0  }
  0x19   :  { %v54_v2 = vunpack.c.l.s4 %v182_v1  ;;  %40 = vst.msk [vmem:[#allocation2] sm:$0x3] %vm39_vm0, %v183_v3  ;;  %v41_v6 = vld [vmem:[#allocation3] sm:$0xff]  ;;  %v42_v7 = vld [vmem:[#allocation3 + $0x8] sm:$0xff]  ;;  %v43_v8 = vld [vmem:[#allocation5] sm:$0xff]  ;;  %vm94_vm1 = vcmask 1041408  }
  0x1a   :  { %v57_v5 = vshrl.u32 %v56_v0, 7  ;;  %v44_v9 = vld [vmem:[#allocation5 + $0x8] sm:$0xff]  ;;  %v45_v10 = vsub.f32 %v41_v6, %v43_v8 }
  0x1b   :  { %v55_v4 = vunpack.c.0.s8 %v54_v2  ;;  %v46_v12 = vsub.f32 %v42_v7, %v44_v9 }
  0x1c   :  { %v48_v13 = vmul.f32 %v45_v10, %v45_v10 }
  0x1d   :  { %v58_v11 = vsub.s32 %v55_v4, %v57_v5  ;;  %v49_v14 = vmul.f32 %v46_v12, %v46_v12 }
  0x1e   :  { %v52_v15 = vcombine.high %v48_v13, %v48_v13 }
  0x1f   :  { %v59_v16 = vrot.slane %v48_v13, %v58_v11  ;;  %v69_v17 = vcombine.high %v49_v14, %v49_v14  ;;  %v76_v20 = vrot.slane %v49_v14, %v58_v11 }
  0x20   :  { %v66_v18 = vrot.slane %v52_v15, %v58_v11  ;;  %v47_v40 = vld [vmem:[#allocation2] sm:$0x3] }
  0x21   :  { %v67_v19 = vcombine.high %v59_v16, %v59_v16  ;;  %v95_v21 = vsel %vm94_vm1, %v59_v16, 0.0  ;;  %v83_v26 = vrot.slane %v69_v17, %v58_v11  ;;  %v84_v27 = vcombine.high %v76_v20, %v76_v20 }
  0x22   :  { %v68_v22 = vcombine.high %v66_v18, %v66_v18  ;;  %v98_v24 = vsel %vm94_vm1, %v66_v18, 0.0  ;;  %v102_v30 = vsel %vm94_vm1, %v76_v20, 0.0 }
  0x23   :  { %v96_v23 = vsel %vm94_vm1, %v67_v19, 0.0  ;;  %v85_v32 = vcombine.high %v83_v26, %v83_v26  ;;  %v104_v33 = vsel %vm94_vm1, %v84_v27, 0.0  ;;  %v106_v35 = vsel %vm94_vm1, %v83_v26, 0.0 }
  0x24   :  { %v97_v25 = vadd.f32 %v96_v23, %v95_v21  ;;  %v100_v28 = vsel %vm94_vm1, %v68_v22, 0.0 }
  0x25   :  { %v108_v37 = vsel %vm94_vm1, %v85_v32, 0.0 }
  0x26   :  { %v99_v29 = vadd.f32 %v98_v24, %v97_v25 }
  0x28   :  { %v101_v31 = vadd.f32 %v100_v28, %v99_v29 }
  0x2a   :  { %v103_v34 = vadd.f32 %v102_v30, %v101_v31 }
  0x2c   :  { %v105_v36 = vadd.f32 %v104_v33, %v103_v34 }
  0x2e   :  { %v107_v38 = vadd.f32 %v106_v35, %v105_v36 }
  0x30   :  { %v109_v39 = vadd.f32 %v108_v37, %v107_v38 }
  0x32   :  { %110 = vadd.xlane.f32.xlu0 %v109_v39 }
  0xbb   :  { %v111_v41 = vpop.xlane.xlu0 %110 }
  0xbc   :  { %v112_v42 = vadd.f32 %v111_v41, %v47_v40 }
  0xbe   :  { %114 = vst.msk [vmem:[#allocation2] sm:$0x3] %vm39_vm0, %v112_v42 }
  0xc5   :  { %v118_v43 = vld [vmem:[#allocation2] sm:$0x3] }
  0xc6   :  { %v119_v44 = vmul.f32 0.0009765625, %v118_v43 }
  0xc8   :  { %134 = vlog2.f32 %v119_v44 }
  0xd5   :  { %v135_v45 = vpop.eup %134 }
  0xd6   :  { %v121_v46 = vmul.f32 0.6931472, %v135_v45 }
  0xd8   :  { %v122_v47 = vmul.f32 -4.3429446, %v121_v46 }
  0xda   :  { %123 = vst.msk [vmem:[%s221_s2] sm:$0x3] %vm39_vm0, %v122_v47 }
  0xdb   :  { %128 = vsyncpa [#allocation4], 1 }
  0xdc   :  { %129 = vsyncpa [#allocation6], 1 }

</bundles_post_ra>
